<compile_context>
chip_gen: v7x
topology: tpu7x:2x2x1
jax: 0.10.0
libtpu: 0.0.40
codegen_flags: <defaults>
</compile_context>

<pallas_src>
import functools
import numpy as np
import jax
import jax.numpy as jnp
from jax import lax
from jax.experimental import pallas as pl
from jax.experimental.pallas import tpu as pltpu


# Set to jnp.bfloat16 on v5e/v6e to halve HBM/VMEM traffic of the (memory-bound) matmuls;
# accumulation stays f32 via preferred_element_type.  f32 keeps exact PyTorch parity.
MATMUL_DTYPE = jnp.float32

# Explicit scoped-VMEM limit, safe on v5e/v6e (128 MiB) and v7x (64 MiB physical).
VMEM_LIMIT_BYTES = 32 * 1024 * 1024
_BLOCK_BYTES_BUDGET = 4 * 1024 * 1024   # per-array per-block budget (Pallas double-buffers)


# ------------------------- tiling helpers -------------------------

def _choose_row_block(H, W, C, multiple=1):
    """Largest row tile TH that divides H, is a multiple of `multiple`, keeps TH*W a
    multiple of 8 (sublane constraint when tiling) and keeps a (TH*W, C) f32 block under
    the per-block VMEM budget.  Falls back to the whole image (block == full dims always
    satisfies the (8,128) rule, even for tiny feature maps)."""
    if H * W * C * 4 <= _BLOCK_BYTES_BUDGET:
        return H
    for th in range(H - 1, 0, -1):
        if H % th or th % multiple or (th * W) % 8:
            continue
        if th * W * C * 4 <= _BLOCK_BYTES_BUDGET:
            return th
    return H


def _conv_row_chunk(H, W, Cin):
    """Bound the (rows*W, 9*Cin) im2col patch built inside the conv kernel."""
    if H * W * 9 * Cin * 4 <= _BLOCK_BYTES_BUDGET:
        return H
    rc = max(1, _BLOCK_BYTES_BUDGET // (W * 9 * Cin * 4))
    return min(H, rc)


# ------------------------- Pallas kernels -------------------------

def _lateral_conv_kernel(x_ref, w_ref, b_ref, o_ref):
    # p5 path: 1x1 conv + bias, no residual (no zero tensor round-tripped through HBM).
    # x: (1, TM, Cin)  w: (Cin, Cp)  b: (1, Cp)  o: (1, TM, Cp)
    acc = jnp.dot(x_ref[0], w_ref[...], preferred_element_type=jnp.float32)
    o_ref[0] = (acc + b_ref[...]).astype(o_ref.dtype)


def _fpn_block_kernel(x_ref, r_ref, w_ref, b_ref, o_ref):
    # Fused FPNBlock: 1x1 conv(skip) + bias + nearest-2x-upsample(coarse pyramid) add.
    # x: (1, TH*W, Cin)  r: (1, TH//2, W//2, Cp)  w: (Cin, Cp)  b: (1, Cp)  o: (1, TH*W, Cp)
    acc = jnp.dot(x_ref[0], w_ref[...], preferred_element_type=jnp.float32) + b_ref[...]
    r = r_ref[0]                                       # (hc, wc, cp) coarse residual tile
    hc, wc, cp = r.shape
    # nearest 2x upsample fused in VMEM (replaces the HBM-materialized nearest_up2).
    r = jnp.broadcast_to(r[:, :, None, :], (hc, wc, 2, cp)).reshape(hc, 2 * wc, cp)
    r = jnp.broadcast_to(r[:, None, :, :], (hc, 2, 2 * wc, cp)).reshape(2 * hc, 2 * wc, cp)
    o_ref[0] = (acc + r.reshape(4 * hc * wc, cp)).astype(o_ref.dtype)


def _conv3x3_gn_relu_kernel(*refs, cpg_is_one, row_chunk):
    if cpg_is_one:
        x_ref, w_ref, gamma_ref, beta_ref, o_ref, xp_ref = refs
        g_ref = gt_ref = None
    else:
        x_ref, w_ref, g_ref, gt_ref, gamma_ref, beta_ref, o_ref, xp_ref = refs

    H, W, Cin = x_ref.shape[1], x_ref.shape[2], x_ref.shape[3]
    Cout = o_ref.shape[2]
    M = H * W

    # In-kernel zero halo (replaces a wrapper-side jnp.pad HBM write + read).
    xp_ref[...] = jnp.zeros_like(xp_ref)
    xp_ref[1:H + 1, 1:W + 1, :] = x_ref[0]
    xp = xp_ref[...]                                   # (H+2, W+2, Cin)

    # im2col + one K=9*Cin MXU matmul per row chunk (instead of 9 small-K matmuls).
    chunks = []
    for r0 in range(0, H, row_chunk):
        rc = min(row_chunk, H - r0)
        taps = []
        for dy in range(3):
            rows = xp[r0 + dy:r0 + dy + rc]            # contiguous full-width row slab
            for dx in range(3):
                taps.append(rows[:, dx:dx + W, :].reshape(rc * W, Cin))
        patch = jnp.concatenate(taps, axis=-1)         # (rc*W, 9*Cin)
        chunks.append(jnp.dot(patch, w_ref[...], preferred_element_type=jnp.float32))
    acc = chunks[0] if len(chunks) == 1 else jnp.concatenate(chunks, axis=0)   # (M, Cout) f32

    # GroupNorm (eps=1e-5), two-pass (mean-centered) variance for numerical robustness.
    if cpg_is_one:
        # groups == Cout: the one-hot group matmuls would be identities -> plain reductions.
        inv_cnt = 1.0 / float(M)
        mean_c = jnp.sum(acc, axis=0, keepdims=True) * inv_cnt
        d = acc - mean_c
        var_c = jnp.sum(d * d, axis=0, keepdims=True) * inv_cnt
    else:
        groups = g_ref.shape[1]
        cnt = float(M * (Cout // groups))
        s_c = jnp.sum(acc, axis=0, keepdims=True)
        mean_g = jnp.dot(s_c, g_ref[...], preferred_element_type=jnp.float32) / cnt
        mean_c = jnp.dot(mean_g, gt_ref[...], preferred_element_type=jnp.float32)
        d = acc - mean_c
        ss_c = jnp.sum(d * d, axis=0, keepdims=True)
        var_g = jnp.dot(ss_c, g_ref[...], preferred_element_type=jnp.float32) / cnt
        var_c = jnp.dot(var_g, gt_ref[...], preferred_element_type=jnp.float32)

    y = d * lax.rsqrt(var_c + 1e-5) * gamma_ref[...] + beta_ref[...]
    o_ref[0] = jnp.maximum(y, 0.0).astype(o_ref.dtype)     # flat (M, Cout) store


# ------------------------- wrappers -------------------------

def lateral_conv(x, w, b):
    """p5 path: 1x1 conv + bias.  x: (N,H,W,Cin) NHWC."""
    N, H, W, Cin = x.shape
    Cp = w.shape[1]
    TH = _choose_row_block(H, W, max(Cin, Cp))
    n_tiles = H // TH
    TM = TH * W
    x2 = x.reshape(N, H * W, Cin).astype(MATMUL_DTYPE)
    out = pl.pallas_call(
        _lateral_conv_kernel,
        out_shape=jax.ShapeDtypeStruct((N, H * W, Cp), jnp.float32),
        grid=(N, n_tiles),
        in_specs=[
            pl.BlockSpec((1, TM, Cin), lambda n, t: (n, t, 0)),
            pl.BlockSpec((Cin, Cp), lambda n, t: (0, 0)),
            pl.BlockSpec((1, Cp), lambda n, t: (0, 0)),
        ],
        out_specs=pl.BlockSpec((1, TM, Cp), lambda n, t: (n, t, 0)),
        compiler_params=pltpu.CompilerParams(
            dimension_semantics=("parallel", "parallel"),
            vmem_limit_bytes=VMEM_LIMIT_BYTES),
    )(x2, w.astype(MATMUL_DTYPE), b.reshape(1, Cp))
    return out.reshape(N, H, W, Cp)


def fpn_block(coarse, skip, w, b):
    """FPNBlock: nearest_up2(coarse) + conv1x1(skip) + bias, fused in one kernel."""
    N, H, W, Cin = skip.shape
    _, Hc, Wc, Cp = coarse.shape
    assert H == 2 * Hc and W == 2 * Wc
    TH = _choose_row_block(H, W, max(Cin, Cp), multiple=2)
    n_tiles = H // TH
    TM = TH * W
    x2 = skip.reshape(N, H * W, Cin).astype(MATMUL_DTYPE)
    out = pl.pallas_call(
        _fpn_block_kernel,
        out_shape=jax.ShapeDtypeStruct((N, H * W, Cp), jnp.float32),
        grid=(N, n_tiles),
        in_specs=[
            pl.BlockSpec((1, TM, Cin), lambda n, t: (n, t, 0)),
            pl.BlockSpec((1, TH // 2, Wc, Cp), lambda n, t: (n, t, 0, 0)),
            pl.BlockSpec((Cin, Cp), lambda n, t: (0, 0)),
            pl.BlockSpec((1, Cp), lambda n, t: (0, 0)),
        ],
        out_specs=pl.BlockSpec((1, TM, Cp), lambda n, t: (n, t, 0)),
        compiler_params=pltpu.CompilerParams(
            dimension_semantics=("parallel", "parallel"),
            vmem_limit_bytes=VMEM_LIMIT_BYTES),
    )(x2, coarse, w.astype(MATMUL_DTYPE), b.reshape(1, Cp))
    return out.reshape(N, H, W, Cp)


def _group_onehot(cout, groups):
    cpg = cout // groups
    return jnp.asarray(np.repeat(np.eye(groups, dtype=np.float32), cpg, axis=0))


def conv3x3_gn_relu(x, w9, gamma, beta, groups=32):
    """Fused Conv3x3(pad=1, no bias) + GroupNorm(groups) + ReLU.  x: (N,H,W,Cin) NHWC."""
    N, H, W, Cin = x.shape
    Cout = w9.shape[2]
    M = H * W
    cpg_is_one = (Cout == groups)
    row_chunk = _conv_row_chunk(H, W, Cin)

    # Weight flattened tap-major: row index = (dy*3+dx)*Cin + cin (matches the im2col concat).
    w_flat = w9.reshape(9 * Cin, Cout).astype(MATMUL_DTYPE)
    kernel = functools.partial(_conv3x3_gn_relu_kernel,
                               cpg_is_one=cpg_is_one, row_chunk=row_chunk)

    in_specs = [
        pl.BlockSpec((1, H, W, Cin), lambda n: (n, 0, 0, 0)),
        pl.BlockSpec((9 * Cin, Cout), lambda n: (0, 0)),
    ]
    args = [x.astype(MATMUL_DTYPE), w_flat]
    if not cpg_is_one:
        g = _group_onehot(Cout, groups)
        in_specs += [pl.BlockSpec((Cout, groups), lambda n: (0, 0)),
                     pl.BlockSpec((groups, Cout), lambda n: (0, 0))]
        args += [g, g.T]
    in_specs += [pl.BlockSpec((1, Cout), lambda n: (0, 0)),
                 pl.BlockSpec((1, Cout), lambda n: (0, 0))]
    args += [gamma.reshape(1, Cout), beta.reshape(1, Cout)]

    out = pl.pallas_call(
        kernel,
        out_shape=jax.ShapeDtypeStruct((N, M, Cout), jnp.float32),
        grid=(N,),
        in_specs=in_specs,
        out_specs=pl.BlockSpec((1, M, Cout), lambda n: (n, 0, 0)),
        scratch_shapes=[pltpu.VMEM((H + 2, W + 2, Cin), MATMUL_DTYPE)],
        compiler_params=pltpu.CompilerParams(
            dimension_semantics=("parallel",),
            vmem_limit_bytes=VMEM_LIMIT_BYTES),
    )(*args)
    # flat (N, H*W, Cout) store; the spatial reshape is free layout plumbing in XLA.
    return out.reshape(N, H, W, Cout)


# ------------------------- bilinear upsample glue (plain JAX) -------------------------

def _bilinear_matrix(in_size, out_size):
    # align_corners=True interpolation matrix (out_size, in_size)
    m = np.zeros((out_size, in_size), np.float32)
    if in_size == 1:
        m[:, 0] = 1.0
        return jnp.asarray(m)
    scale = (in_size - 1) / (out_size - 1)
    for i in range(out_size):
        src = i * scale
        i0 = min(int(np.floor(src)), in_size - 2)
        f = src - i0
        m[i, i0] += 1.0 - f
        m[i, i0 + 1] += f
    return jnp.asarray(m)


def bilinear_up2(x):
    # F.interpolate(scale_factor=2, mode='bilinear', align_corners=True) on NHWC
    N, H, W, C = x.shape
    Ah = _bilinear_matrix(H, 2 * H)
    Aw = _bilinear_matrix(W, 2 * W)
    t = jnp.einsum('ih,nhwc->niwc', Ah, x)
    return jnp.einsum('jw,niwc->nijc', Aw, t)


# ------------------------- FPNDecoder params & forward -------------------------

def init_fpn_decoder_params(key, encoder_channels, encoder_depth=5,
                            pyramid_channels=64, segmentation_channels=32):
    enc = list(encoder_channels[::-1])[:encoder_depth + 1]
    keys = iter(jax.random.split(key, 64))

    def dense(cin, cout):
        return jax.random.normal(next(keys), (cin, cout), jnp.float32) * 0.1

    def bias(cout):
        return jax.random.normal(next(keys), (cout,), jnp.float32) * 0.05

    def conv3x3(cin, cout):
        return jax.random.normal(next(keys), (9, cin, cout), jnp.float32) * (0.1 / 3.0)

    params = {
        "p5": {"w": dense(enc[0], pyramid_channels), "b": bias(pyramid_channels)},
        "p4": {"w": dense(enc[1], pyramid_channels), "b": bias(pyramid_channels)},
        "p3": {"w": dense(enc[2], pyramid_channels), "b": bias(pyramid_channels)},
        "p2": {"w": dense(enc[3], pyramid_channels), "b": bias(pyramid_channels)},
        "seg": [],
    }
    # SegmentationBlocks with n_upsamples = [3, 2, 1, 0]
    for n_up in [3, 2, 1, 0]:
        layers = []
        cin = pyramid_channels
        for _ in range(max(n_up, 1)):
            layers.append({
                "w": conv3x3(cin, segmentation_channels),
                "gamma": 1.0 + 0.1 * jax.random.normal(next(keys), (segmentation_channels,), jnp.float32),
                "beta": 0.05 * jax.random.normal(next(keys), (segmentation_channels,), jnp.float32),
                "upsample": bool(n_up > 0),
            })
            cin = segmentation_channels
        params["seg"].append(layers)
    return params


def fpn_decoder_forward(params, *features, merge_policy="add"):
    # features are NCHW (PyTorch convention); decoder uses the last four: c2, c3, c4, c5
    c2, c3, c4, c5 = [jnp.transpose(f, (0, 2, 3, 1)) for f in features[-4:]]  # -> NHWC

    p5 = lateral_conv(c5, params["p5"]["w"], params["p5"]["b"])
    p4 = fpn_block(p5, c4, params["p4"]["w"], params["p4"]["b"])
    p3 = fpn_block(p4, c3, params["p3"]["w"], params["p3"]["b"])
    p2 = fpn_block(p3, c2, params["p2"]["w"], params["p2"]["b"])

    pyramid = []
    for layers, p in zip(params["seg"], [p5, p4, p3, p2]):
        x = p
        for layer in layers:
            x = conv3x3_gn_relu(x, layer["w"], layer["gamma"], layer["beta"], groups=32)
            if layer["upsample"]:
                # TODO(synk): fuse separable bilinear (Ah/Aw matmuls) into the conv epilogue.
                x = bilinear_up2(x)
        pyramid.append(x)

    x = sum(pyramid) if merge_policy == "add" else jnp.concatenate(pyramid, axis=-1)

    # Dropout2d(p=0.2): identity at inference.
    # TODO(synk): training-mode Dropout2d (per-channel dropout) not implemented.
    return jnp.transpose(x, (0, 3, 1, 2))  # back to NCHW


# ------------------------- main -------------------------

if __name__ == "__main__":
    key = jax.random.PRNGKey(0)
    k_params, k2, k3, k4, k5 = jax.random.split(key, 5)

    # encoder_channels listed shallow->deep (as an smp encoder would report them)
    encoder_channels = (3, 8, 16, 32, 64, 128)
    N = 2
    # NCHW features: c2 (1/4), c3 (1/8), c4 (1/16), c5 (1/32)
    c2 = jax.random.normal(k2, (N, 16, 16, 16), jnp.float32)
    c3 = jax.random.normal(k3, (N, 32, 8, 8), jnp.float32)
    c4 = jax.random.normal(k4, (N, 64, 4, 4), jnp.float32)
    c5 = jax.random.normal(k5, (N, 128, 2, 2), jnp.float32)

    params = init_fpn_decoder_params(
        k_params, encoder_channels, encoder_depth=5,
        pyramid_channels=64, segmentation_channels=32)

    out = fpn_decoder_forward(params, c2, c3, c4, c5, merge_policy="add")
    out = jax.block_until_ready(out)

    assert out.shape == (N, 32, 16, 16), out.shape
    assert bool(jnp.all(jnp.isfinite(out)))
    print("KERNEL_OK")
</pallas_src>

<mosaic_0001>
module attributes {stable_mosaic.version = 11 : i64} {
  func.func @_lateral_conv_kernel(%arg0: i32, %arg1: i32, %arg2: memref<1x4x128xf32, #tpu.memory_space<vmem>>, %arg3: memref<128x64xf32, #tpu.memory_space<vmem>>, %arg4: memref<1x64xf32, #tpu.memory_space<vmem>>, %arg5: memref<1x4x64xf32, #tpu.memory_space<vmem>>) attributes {dimension_semantics = [#tpu.dimension_semantics<parallel>, #tpu.dimension_semantics<parallel>], iteration_bounds = array<i64: 2, 1>, scalar_prefetch = 0 : i64, scratch_operands = 0 : i64, tpu.core_type = #tpu.core_type<tc>, window_params = [{transform_indices = @transform_0, window_bounds = array<i64: 1, 4, 128>}, {pipeline_mode = #tpu.pipeline_mode<synchronous>, transform_indices = @transform_1, window_bounds = array<i64: 128, 64>}, {pipeline_mode = #tpu.pipeline_mode<synchronous>, transform_indices = @transform_2, window_bounds = array<i64: 1, 64>}, {transform_indices = @transform_3, window_bounds = array<i64: 1, 4, 64>}]} {
    %c0 = arith.constant 0 : index
    %c0_0 = arith.constant 0 : index
    %c0_1 = arith.constant 0 : index
    %0 = vector.load %arg2[%c0, %c0_0, %c0_1] : memref<1x4x128xf32, #tpu.memory_space<vmem>>, vector<1x4x128xf32>
    %1 = vector.shape_cast %0 : vector<1x4x128xf32> to vector<4x128xf32>
    %c0_2 = arith.constant 0 : index
    %c0_3 = arith.constant 0 : index
    %2 = vector.load %arg3[%c0_2, %c0_3] : memref<128x64xf32, #tpu.memory_space<vmem>>, vector<128x64xf32>
    %cst = arith.constant dense<0.000000e+00> : vector<4x64xf32>
    %3 = tpu.matmul %1, %2, %cst {dimension_numbers = #tpu.dot_dimension_numbers<[1], [0], [0], [1], [0, 0, 1, 1], [], []>} : vector<4x128xf32>, vector<128x64xf32>, vector<4x64xf32> -> vector<4x64xf32>
    %c0_4 = arith.constant 0 : index
    %c0_5 = arith.constant 0 : index
    %4 = vector.load %arg4[%c0_4, %c0_5] : memref<1x64xf32, #tpu.memory_space<vmem>>, vector<1x64xf32>
    %5 = vector.broadcast %4 : vector<1x64xf32> to vector<4x64xf32>
    %6 = arith.addf %3, %5 : vector<4x64xf32>
    %c0_6 = arith.constant 0 : index
    %c0_7 = arith.constant 0 : index
    %c0_8 = arith.constant 0 : index
    %7 = vector.load %arg5[%c0_6, %c0_7, %c0_8] : memref<1x4x64xf32, #tpu.memory_space<vmem>>, vector<1x4x64xf32>
    %8 = vector.shape_cast %7 : vector<1x4x64xf32> to vector<4x64xf32>
    %9 = vector.shape_cast %6 : vector<4x64xf32> to vector<1x4x64xf32>
    tpu.vector_store %arg5[%c0_6, %c0_7, %c0_8], %9 {strides = array<i32>} : memref<1x4x64xf32, #tpu.memory_space<vmem>>, vector<1x4x64xf32>,
    return
  }
  func.func @transform_0(%arg0: i32, %arg1: i32) -> (i32, i32, i32) {
    %c0_i32 = arith.constant 0 : i32
    %c0_i32_0 = arith.constant 0 : i32
    return %arg0, %arg1, %c0_i32 : i32, i32, i32
  }
  func.func @transform_1(%arg0: i32, %arg1: i32) -> (i32, i32) {
    %c0_i32 = arith.constant 0 : i32
    %c0_i32_0 = arith.constant 0 : i32
    %c0_i32_1 = arith.constant 0 : i32
    return %c0_i32, %c0_i32_0 : i32, i32
  }
  func.func @transform_2(%arg0: i32, %arg1: i32) -> (i32, i32) {
    %c0_i32 = arith.constant 0 : i32
    %c0_i32_0 = arith.constant 0 : i32
    %c0_i32_1 = arith.constant 0 : i32
    return %c0_i32, %c0_i32_0 : i32, i32
  }
  func.func @transform_3(%arg0: i32, %arg1: i32) -> (i32, i32, i32) {
    %c0_i32 = arith.constant 0 : i32
    %c0_i32_0 = arith.constant 0 : i32
    return %arg0, %arg1, %c0_i32 : i32, i32, i32
  }
}

</mosaic_0001>

<bundles_post_ra>
// kernel: tpu_custom_call.1
= control target key start
LH: loop header
LB: loop body
LE: loop exit
PB: predicated region body
PF: predicated region fallthrough
CT: control target
= control target key end

     0   :  { %8 = vsyncpa [#allocation3], 0  ;;  %s786_s0 = inlined_call_operand.vmem [shape: f32[2,4,128], index: 0, kind: input, shape index: {}]   ;;  %s787_s1 = inlined_call_operand.vmem [shape: f32[128,64], index: 1, kind: input, shape index: {}]   ;;  %s788_s2 = inlined_call_operand.vmem [shape: f32[1,64], index: 2, kind: input, shape index: {}]   ;;  %s789_s3 = inlined_call_operand.hbm [shape: f32[2,4,64], index: 3, kind: output, shape index: {}]  }
   0x1   :  { %10 = vsyncpa [#allocation3 + $0x1], 0  ;;  %s623_s12 = smov 0   ;;  %s625_s13 = smov 0  }
   0x2   :  { %s627_s14 = smov 0   ;;  %s629_s15 = smov 0  }
   0x3   :  { %s631_s16 = smov 0   ;;  %s633_s17 = smov 0  }
   0x4 LB: > { %s373_s18 = sadd.s32 4294967295, %s597_s17   ;;  %s374_s19 = sadd.s32 4294967294, %s597_s17   ;;  %s597_s17 = sphi %s633_s17, %s16_s17   ;;  %s593_s16 = sphi %s631_s16, %s796_s16   ;;  %s589_s15 = sphi %s629_s15, %s795_s15   ;;  %s585_s14 = sphi %s627_s14, %s794_s14   ;;  %s581_s13 = sphi %s625_s13, %s793_s13   ;;  %s577_s12 = sphi %s623_s12, %s792_s12  }
   0x5   : > { %s28_s20 = sadd.s32 1, %s593_s16  ;;  %s107_s21 = sadd.s32 1, %s585_s14 }
   0x6   : > { %p30_p0 = scmp.ge.s32.totalorder %s28_s20, 2  ;;  %p117_p1 = scmp.ne.s32.totalorder %s585_s14, %s581_s13 }
   0x7   : > { %p118_p2 = scmp.eq.s32.totalorder %s373_s18, 1  ;;  %p123_p3 = scmp.ne.s32.totalorder %s581_s13, %s577_s12 }
   0x8   : > { %s798_s20 = smov (%p30_p0, %s28_s20), 0  ;;  %p124_p5 = scmp.eq.s32.totalorder %s374_s19, 1 }
   0x9   : > { %p663_p4 = por %p118_p2, %p117_p1  ;;  %s102_s23 = ssub.s32 %s593_s16, %s798_s20 }
   0xa   : > { %p377_p6 = scmp.ge.s32.totalorder %s597_s17, 1  ;;  %p105_p7 = scmp.eq.s32.totalorder %s102_s23, 0 }
   0xb   : > { %p670_p8 = por %p124_p5, %p123_p3  ;;  %p158_p9 = scmp.lt.s32.totalorder %s597_s17, 3 }
   0xc   : > { %s676_s25 = scalar_select %p105_p7, %s585_s14, %s107_s21  }
   0xd   : > { %p159_p10 = pnand %p377_p6, %p158_p9 }
   0xe   : > { %v192_v0 = vld [vmem:[%s787_s1] sm:$0xff] (!%p159_p10)  ;;  %v193_v1 = vld [vmem:[%s787_s1 + $0x8] sm:$0xff] (!%p159_p10)  ;;  %v194_v2 = vld [vmem:[%s787_s1 + $0x10] sm:$0xff] (!%p159_p10)  ;;  %v599_v3 = vmov (!%p159_p10), 0.0|0.0   ;;  %vm600_vm0 = vmmov (!%p159_p10), 0   ;;  %v601_v6 = vmov (!%p159_p10), 0.0  }
   0xf   : > { %162 = sbr.rel (%p159_p10) target bundleno = 276 (0x114), region = 32  ;;  %437 = vmatprep.subr.bf16.mxu0 (!%p159_p10), %v599_v3  ;;  %v438_v4 = vpack.c.bf16 (!%p159_p10), %v193_v1, %v192_v0  ;;  %v195_v5 = vld [vmem:[%s787_s1 + $0x18] sm:$0xff] (!%p159_p10)  ;;  %434 = vmatprep.mubr.msk.f32.mxu0 (!%p159_p10), %vm600_vm0, %v601_v6  ;;  %v196_v8 = vld [vmem:[%s787_s1 + $0x20] sm:$0xff] (!%p159_p10)  ;;  %v197_v9 = vld [vmem:[%s787_s1 + $0x28] sm:$0xff] (!%p159_p10)  ;;  %p184_p11 = scmp.lt.s32.totalorder (!%p159_p10), %s589_s15, 1  ;;  %vm285_vm1 = vcmask (!%p159_p10), 519168  }
  0x10   : > { %v441_v7 = vpack.c.bf16 (!%p159_p10), %v195_v5, %v194_v2  ;;  %v444_v10 = vpack.c.bf16 (!%p159_p10), %v197_v9, %v196_v8  ;;  %v198_v11 = vld [vmem:[%s787_s1 + $0x30] sm:$0xff] (!%p159_p10)  ;;  %v199_v12 = vld [vmem:[%s787_s1 + $0x38] sm:$0xff] (!%p159_p10)  ;;  %v200_v14 = vld [vmem:[%s787_s1 + $0x40] sm:$0xff] (!%p159_p10)  ;;  %s181_s29 = sand.u32 (!%p159_p10), 1, %s581_s13   ;;  %s382_s6 = sshll.u32 (!%p159_p10), %s589_s15, 6 }
  0x11   : > { %439 = vmatpush3.bf16.msra.mxu0 (!%p159_p10), %v438_v4  ;;  %v447_v13 = vpack.c.bf16 (!%p159_p10), %v199_v12, %v198_v11  ;;  %v201_v15 = vld [vmem:[%s787_s1 + $0x48] sm:$0xff] (!%p159_p10)  ;;  %v202_v17 = vld [vmem:[%s787_s1 + $0x50] sm:$0xff] (!%p159_p10)  ;;  %v203_v18 = vld [vmem:[%s787_s1 + $0x58] sm:$0xff] (!%p159_p10)  ;;  %s378_s30 = sshll.u32 (!%p159_p10), %s181_s29, 2  ;;  %s739_s11 = scalar_lea.hbm (!%p159_p10), %s789_s3, %s382_s6 }
  0x12   : > { %440 = vmatprep.subr.bf16.mxu0 (!%p159_p10), %v599_v3  ;;  %v450_v16 = vpack.c.bf16 (!%p159_p10), %v201_v15, %v200_v14  ;;  %v453_v19 = vpack.c.bf16 (!%p159_p10), %v203_v18, %v202_v17  ;;  %v204_v20 = vld [vmem:[%s787_s1 + $0x60] sm:$0xff] (!%p159_p10)  ;;  %v205_v21 = vld [vmem:[%s787_s1 + $0x68] sm:$0xff] (!%p159_p10)  ;;  %v206_v23 = vld [vmem:[%s787_s1 + $0x70] sm:$0xff] (!%p159_p10)  ;;  %s183_s7 = scalar_lea.vmem (!%p159_p10), [#allocation2], %s378_s30  ;;  %s288_s18 = scalar_lea.sflag (!%p159_p10), [#allocation3], %s181_s29 }
  0x13   : > { %v456_v22 = vpack.c.bf16 (!%p159_p10), %v205_v21, %v204_v20  ;;  %v207_v24 = vld [vmem:[%s787_s1 + $0x78] sm:$0xff] (!%p159_p10)  ;;  %v380_v27 = vld [vmem:[%s788_s2] ss:$0 sm:$0xff] (!%p159_p10)  ;;  %s302_s8 = sshll.u32 (!%p159_p10), %s183_s7, 4  ;;  %s741_s8 = int_to_ptr.vmem [resolvable:$true] %s302_s8 }
  0x14   : > { %v459_v25 = vpack.c.bf16 (!%p159_p10), %v207_v24, %v206_v23  ;;  %s519_s19 = scalar_lea.vmem (!%p159_p10), %s741_s8, 64 }
  0x15   : > { %442 = vmatpush3.bf16.msra.mxu0 (!%p159_p10), %v441_v7  ;;  %p520_p12 = scmp.ne.s32.totalorder (!%p159_p10), %s741_s8, %s519_s19 }
  0x16   : > { %443 = vmatprep.subr.bf16.mxu0 %v599_v3  ;;  %s185_s10 = scalar_select %p184_p11, %s589_s15, 1 }
  0x17   : > { %p521_p13 = pnand %p520_p12, %p663_p4  ;;  %s602_s15 = smov [#allocation2]  }
  0x18   : > { %s379_s23 = sshll.u32 %s185_s10, 2  ;;  %s523_s21 = sshll.u32 %s602_s15, 4  ;;  %s524_s21 = int_to_ptr.vmem [resolvable:$false] %s523_s21 }
  0x19   : > { %445 = vmatpush3.bf16.msra.mxu0 %v444_v10  ;;  %s190_s28 = scalar_lea.vmem %s786_s0, %s379_s23  ;;  %p522_p0 = pneg %p521_p13 }
  0x1a   : > { %446 = vmatprep.subr.bf16.mxu0 %v599_v3  ;;  %v191_v26 = vld [vmem:[%s190_s28] sm:$0xf]  ;;  %s525_s23 = scalar_lea.vmem %s524_s21, 128  ;;  %p526_p1 = scmp.lt.s32.totalorder %s741_s8, %s524_s21 }
  0x1b   : > { %p527_p2 = scmp.lt.s32.totalorder %s525_s23, %s519_s19 }
  0x1d   : > { %448 = vmatpush3.bf16.msra.mxu0 %v447_v13  ;;  %p528_p3 = por %p527_p2, %p526_p1 }
  0x1e   : > { %449 = vmatprep.subr.bf16.mxu0 %v599_v3 }
  0x1f   : > { %p529_p5 = pnand %p528_p3, %p522_p0 }
  0x21   : > { %451 = vmatpush3.bf16.msra.mxu0 %v450_v16 }
  0x22   : > { %452 = vmatprep.subr.bf16.mxu0 %v599_v3 }
  0x25   : > { %454 = vmatpush3.bf16.msra.mxu0 %v453_v19 }
  0x26   : > { %455 = vmatprep.subr.bf16.mxu0 %v599_v3 }
  0x29   : > { %457 = vmatpush3.bf16.msra.mxu0 %v456_v22 }
  0x2a   : > { %458 = vmatprep.subr.bf16.mxu0 %v599_v3 }
  0x2d   : > { %460 = vmatpush3.bf16.msra.mxu0 %v459_v25 }
  0x30   : > { %435 = vmatmul.mubr.f32.vlgmr.msra.gmra.mrb[0].mxu0 %v191_v26 }
 0x103   : > { %v281_v28 = vpop.f32.mrb[0].mxu0 }
 0x104   : > { %v282_v29 = vadd.f32 %v380_v27, %v281_v28  ;;  %v436_v30 = vpop.f32.mrb[1].mxu0 }
 0x106   : > { %286 = vst.msk [vmem:[%s183_s7] sm:$0xf] %vm285_vm1, %v282_v29 }
 0x107   : > { %532 = shalt.err (!%p529_p5)
}
 0x108   : > { %s533_s26 = scalar_lea.hbm %s739_s11, 64  ;;  %s537_s29 = scalar_lea.hbm %s789_s3, 128 }
 0x109   : > { %p534_p6 = scmp.ne.s32.totalorder %s739_s11, %s533_s26  ;;  %p538_p10 = scmp.lt.u32.totalorder %s739_s11, %s789_s3 }
 0x10a   : > { %p539_p11 = scmp.lt.u32.totalorder %s537_s29, %s533_s26  ;;  %p541_p13 = scmp.lt.u32.totalorder %s533_s26, %s739_s11 }
 0x10b   : > { %p535_p7 = pnand %p534_p6, %p663_p4 }
 0x10c   : > { %p540_p12 = por %p539_p11, %p538_p10 }
 0x10d   : > { %p536_p9 = pneg %p535_p7 }
 0x10e   : > { %p542_p0 = por %p541_p13, %p540_p12 }
 0x110   : > { %p543_p1 = pnand %p542_p0, %p536_p9 }
 0x112   : > { %546 = shalt.err (!%p543_p1)
}
 0x113   : > { %461 = dma.vmem_to_hbm [thread:$0]  (%p663_p4), %s741_s8, 64, %s739_s11, %s288_s18  }
 0x114 PF: > { %p467_p2 = scmp.ge.s32.totalorder %s597_s17, 2  ;;  %s314_s5 = sand.u32 1, %s577_s12  }
 0x115   : > { %s315_s6 = scalar_lea.sflag [#allocation3], %s314_s5 }
 0x116   : > { %p464_p3 = pnand %p467_p2, %p670_p8 }
 0x118   : > { %572 = dma.done.wait (!%p464_p3), %s315_s6, 64  }
 0x119   : > { %574 = vsyncadd (!%p464_p3), %s315_s6, 4294967232  ;;  %s16_s17 = sadd.s32 1, %s597_s17   ;;  %s792_s12 = smov %s581_s13 }
 0x11a   : > { %p13_p5 = scmp.ge.s32.totalorder %s16_s17, 4   ;;  %s793_s13 = smov %s585_s14 }
 0x11b   : > { %s794_s14 = smov %s676_s25  ;;  %s795_s15 = smov %s593_s16 }
 0x11c   : > { %s796_s16 = smov %s798_s20  ;;  %15 = sbr.rel (!%p13_p5) target bundleno = 4 (0x4), region = 67 }
 0x123   :  { %320 = vsyncpa [#allocation3], 1 }
 0x124   :  { %322 = vsyncpa [#allocation3 + $0x1], 1 }

</bundles_post_ra>
